<compile_context>
chip_gen: v6e
topology: v6e:2x2x1
jax: 0.10.0
libtpu: 0.0.40
codegen_flags: <defaults>
</compile_context>

<pallas_src>
import functools

import jax
import jax.numpy as jnp
from jax.experimental import pallas as pl
from jax.experimental.pallas import tpu as pltpu

_LANES = 384                      # 3 * 128 -> lane c corresponds to column c % 3
_DEFAULT_BLOCK_ROWS = 4096        # (4096, 384) f32 = 6 MiB per grid step
_SMALL_FAST_PATH_ELEMS = 1 << 16  # below this, plain jnp beats a kernel launch


def _round_up(a, b):
    return (a + b - 1) // b * b


def _partial_sums_kernel(x_ref, acc_ref, *, block_rows, tiles_total,
                         tiles_per_split, total_rows):
    # x_ref:   (block_rows, 384) input tile in its native dtype
    # acc_ref: (8, 384) f32 output block, resident across the reduction axis
    s = pl.program_id(0)          # core-split axis ("parallel")
    t = pl.program_id(1)          # tile axis within the split ("arbitrary")

    @pl.when(t == 0)
    def _init():
        acc_ref[...] = jnp.zeros_like(acc_ref)

    # Logical (un-clamped) tile index; the index_map clamps the DMA, the mask
    # below zeroes anything this tile does not actually own.
    tile_idx = s * tiles_per_split + t

    def fold(x):
        # (block_rows, 384) -> (block_rows//8, 8, 384) regroups whole (8,128)
        # tiles; the reduce over axis 0 is pure VALU adds (no XLU in the loop).
        return jnp.sum(x.reshape(-1, 8, x.shape[-1]), axis=0)

    @pl.when(tile_idx < tiles_total - 1)
    def _full_tile():
        acc_ref[...] += fold(x_ref[...].astype(jnp.float32))

    @pl.when(tile_idx >= tiles_total - 1)
    def _tail_tile():
        # Last real tile (possibly ragged) or clamped phantom tile: mask rows
        # past the true row count with a select so OOB garbage cannot leak in.
        x = x_ref[...].astype(jnp.float32)
        row = (jax.lax.broadcasted_iota(jnp.int32, x.shape, 0)
               + tile_idx * block_rows)
        x = jnp.where(row < total_rows, x, 0.0)
        acc_ref[...] += fold(x)


def weighted_mse_loss(action_error, lambda_linear=1.0, lambda_angular=10.0, *,
                      block_rows=None, force_pallas=False):
    """action_error: (B, 3) array (f32 or bf16). Returns scalar f32 loss."""
    B, C = action_error.shape
    assert C == 3, "WeightedMSELoss expects (batch, 3) pose errors"
    total = B * C

    # Per-column weights built with jnp so traced lambdas never recompile.
    w3 = jnp.stack([jnp.asarray(lambda_linear, jnp.float32),
                    jnp.asarray(lambda_angular, jnp.float32),
                    jnp.asarray(1.0, jnp.float32)])

    # Small-batch fast path: launch overhead dominates below ~64K elements.
    if not force_pallas and total < _SMALL_FAST_PATH_ELEMS:
        return jnp.mean(action_error.astype(jnp.float32) * w3)

    # Copy-free (R, 384) row-major view of the (B, 3) array.
    flat = action_error.reshape(total)          # metadata-only reshape
    rem = total % _LANES
    if rem:
        # Only when B % 128 != 0: pad < 384 zeros (sum-neutral, true total is
        # still used for the mean). The B % 128 == 0 path is fully copy-free.
        flat = jnp.pad(flat, (0, _LANES - rem))
    R = flat.shape[0] // _LANES
    x2d = flat.reshape(R, _LANES)               # metadata-only reshape

    if block_rows is None:
        block_rows = _DEFAULT_BLOCK_ROWS
    block_rows = max(8, min(_round_up(block_rows, 8), _round_up(R, 8)))

    tiles_total = pl.cdiv(R, block_rows)
    # Split the tile range in two so v7x can use both TensorCores; on v5e/v6e
    # this just runs sequentially (at most one cheap fully-masked phantom step).
    n_splits = 2 if tiles_total >= 2 else 1
    tiles_per_split = pl.cdiv(tiles_total, n_splits)

    kernel = functools.partial(
        _partial_sums_kernel,
        block_rows=block_rows,
        tiles_total=tiles_total,
        tiles_per_split=tiles_per_split,
        total_rows=R,
    )

    acc = pl.pallas_call(
        kernel,
        out_shape=jax.ShapeDtypeStruct((n_splits, 8, _LANES), jnp.float32),
        grid_spec=pltpu.PrefetchScalarGridSpec(
            num_scalar_prefetch=0,
            grid=(n_splits, tiles_per_split),
            in_specs=[
                pl.BlockSpec(
                    (block_rows, _LANES),
                    # Clamp so a phantom tile re-reads the last real block
                    # (its contribution is fully masked in-kernel).
                    lambda s, t: (jnp.minimum(s * tiles_per_split + t,
                                              tiles_total - 1), 0),
                ),
            ],
            out_specs=pl.BlockSpec((None, 8, _LANES), lambda s, t: (s, 0, 0)),
        ),
        compiler_params=pltpu.CompilerParams(
            dimension_semantics=("parallel", "arbitrary"),
        ),
    )(x2d)

    # Finalize on the tiny (n_splits, 8, 384) partial sums: period-3 lane
    # weights + mean normalization by the true element count.
    w_row = jnp.tile(w3, _LANES // 3)           # (384,)
    return jnp.sum(acc * w_row) * jnp.float32(1.0 / total)


def _reference(action_error, lambda_linear=1.0, lambda_angular=10.0):
    # Pure-JAX reference mirroring the PyTorch forward.
    e = action_error.astype(jnp.float32)
    e = e.at[:, 0].multiply(lambda_linear)
    e = e.at[:, 1].multiply(lambda_angular)
    return e.mean()


if __name__ == "__main__":
    key = jax.random.PRNGKey(0)
    B = 8  # small batch, matches the module's (#batch, 3) contract
    k1, k2 = jax.random.split(key)
    xy = jax.random.uniform(k1, (B, 2), jnp.float32, minval=-50.0, maxval=50.0)
    yaw = jax.random.uniform(k2, (B, 1), jnp.float32, minval=-3.14159, maxval=3.14159)
    action_error = jnp.concatenate([xy, yaw], axis=1)  # (B, 3)

    # Force the Pallas path (small batches would otherwise take the jnp path).
    loss = jax.block_until_ready(
        weighted_mse_loss(action_error, 1.0, 10.0, force_pallas=True))
    ref = _reference(action_error, 1.0, 10.0)
    assert jnp.allclose(loss, ref, rtol=1e-5, atol=1e-5), (loss, ref)

    # Ragged batch (B % 128 != 0) with tiny blocks: exercises multi-tile
    # accumulation, the 2-way core split (with one clamped phantom tile) and
    # the in-kernel tail mask.
    big = jax.random.uniform(jax.random.PRNGKey(1), (4500, 3), jnp.float32,
                             minval=-50.0, maxval=50.0)
    loss_big = jax.block_until_ready(
        weighted_mse_loss(big, 1.0, 10.0, force_pallas=True, block_rows=8))
    ref_big = _reference(big, 1.0, 10.0)
    assert jnp.allclose(loss_big, ref_big, rtol=1e-3, atol=1e-3), (loss_big, ref_big)

    # Copy-free path: B % 128 == 0, native bf16 streamed without wrapper upcast.
    bb = jax.random.uniform(jax.random.PRNGKey(2), (2048, 3), jnp.float32,
                            minval=-50.0, maxval=50.0).astype(jnp.bfloat16)
    loss_bf = jax.block_until_ready(
        weighted_mse_loss(bb, 1.0, 10.0, force_pallas=True))
    ref_bf = _reference(bb, 1.0, 10.0)
    assert jnp.allclose(loss_bf, ref_bf, rtol=1e-3, atol=1e-3), (loss_bf, ref_bf)

    # Default call (small batch -> jnp fast path) for sanity.
    loss_fast = jax.block_until_ready(weighted_mse_loss(action_error, 1.0, 10.0))
    assert jnp.allclose(loss_fast, ref, rtol=1e-5, atol=1e-5), (loss_fast, ref)

    print("KERNEL_OK")
</pallas_src>

<mosaic_0001>
module attributes {stable_mosaic.version = 11 : i64} {
  func.func @_partial_sums_kernel(%arg0: i32, %arg1: i32, %arg2: memref<8x384xf32, #tpu.memory_space<vmem>>, %arg3: memref<1x8x384xf32, #tpu.memory_space<vmem>>) attributes {dimension_semantics = [#tpu.dimension_semantics<parallel>, #tpu.dimension_semantics<arbitrary>], iteration_bounds = array<i64: 1, 1>, scalar_prefetch = 0 : i64, scratch_operands = 0 : i64, tpu.core_type = #tpu.core_type<tc>, window_params = [{transform_indices = @transform_0, window_bounds = array<i64: 8, 384>}, {transform_indices = @transform_1, window_bounds = array<i64: 1, 8, 384>}]} {
    %c0_i32 = arith.constant 0 : i32
    %0 = arith.cmpi eq, %arg1, %c0_i32 : i32
    %1 = arith.extui %0 : i1 to i32
    %c0_i32_0 = arith.constant 0 : i32
    %2 = arith.cmpi ne, %1, %c0_i32_0 : i32
    scf.if %2 {
      %cst = arith.constant 0.000000e+00 : f32
      %11 = vector.broadcast %cst : f32 to vector<8x384xf32>
      %c0 = arith.constant 0 : index
      %c0_5 = arith.constant 0 : index
      %c0_6 = arith.constant 0 : index
      %12 = vector.load %arg3[%c0, %c0_5, %c0_6] : memref<1x8x384xf32, #tpu.memory_space<vmem>>, vector<1x8x384xf32>
      %13 = vector.shape_cast %12 : vector<1x8x384xf32> to vector<8x384xf32>
      %14 = vector.shape_cast %11 : vector<8x384xf32> to vector<1x8x384xf32>
      tpu.vector_store %arg3[%c0, %c0_5, %c0_6], %14 {strides = array<i32>} : memref<1x8x384xf32, #tpu.memory_space<vmem>>, vector<1x8x384xf32>,
    } else {
    }
    %c1_i32 = arith.constant 1 : i32
    %3 = arith.muli %arg0, %c1_i32 : i32
    %4 = arith.addi %3, %arg1 : i32
    %c0_i32_1 = arith.constant 0 : i32
    %5 = arith.cmpi slt, %4, %c0_i32_1 : i32
    %6 = arith.extui %5 : i1 to i32
    %c0_i32_2 = arith.constant 0 : i32
    %7 = arith.cmpi ne, %6, %c0_i32_2 : i32
    scf.if %7 {
      %c0 = arith.constant 0 : index
      %c0_5 = arith.constant 0 : index
      %c0_6 = arith.constant 0 : index
      %11 = vector.load %arg3[%c0, %c0_5, %c0_6] : memref<1x8x384xf32, #tpu.memory_space<vmem>>, vector<1x8x384xf32>
      %12 = vector.shape_cast %11 : vector<1x8x384xf32> to vector<8x384xf32>
      %c0_7 = arith.constant 0 : index
      %c0_8 = arith.constant 0 : index
      %13 = vector.load %arg2[%c0_7, %c0_8] : memref<8x384xf32, #tpu.memory_space<vmem>>, vector<8x384xf32>
      %14 = vector.shape_cast %13 : vector<8x384xf32> to vector<1x8x384xf32>
      %cst = arith.constant dense<0.000000e+00> : vector<8x384xf32>
      %15 = vector.multi_reduction <add>, %14, %cst [0] : vector<1x8x384xf32> to vector<8x384xf32>
      %16 = arith.addf %12, %15 : vector<8x384xf32>
      %c0_9 = arith.constant 0 : index
      %c0_10 = arith.constant 0 : index
      %c0_11 = arith.constant 0 : index
      %17 = vector.load %arg3[%c0_9, %c0_10, %c0_11] : memref<1x8x384xf32, #tpu.memory_space<vmem>>, vector<1x8x384xf32>
      %18 = vector.shape_cast %17 : vector<1x8x384xf32> to vector<8x384xf32>
      %19 = vector.shape_cast %16 : vector<8x384xf32> to vector<1x8x384xf32>
      tpu.vector_store %arg3[%c0_9, %c0_10, %c0_11], %19 {strides = array<i32>} : memref<1x8x384xf32, #tpu.memory_space<vmem>>, vector<1x8x384xf32>,
    } else {
    }
    %c0_i32_3 = arith.constant 0 : i32
    %8 = arith.cmpi sge, %4, %c0_i32_3 : i32
    %9 = arith.extui %8 : i1 to i32
    %c0_i32_4 = arith.constant 0 : i32
    %10 = arith.cmpi ne, %9, %c0_i32_4 : i32
    scf.if %10 {
      %c0 = arith.constant 0 : index
      %c0_5 = arith.constant 0 : index
      %11 = vector.load %arg2[%c0, %c0_5] : memref<8x384xf32, #tpu.memory_space<vmem>>, vector<8x384xf32>
      %12 = tpu.iota {dimensions = array<i32: 0>} : vector<8x384xi32>
      %c8_i32 = arith.constant 8 : i32
      %13 = arith.muli %4, %c8_i32 : i32
      %14 = vector.broadcast %13 : i32 to vector<8x384xi32>
      %15 = arith.addi %12, %14 : vector<8x384xi32>
      %c1_i32_6 = arith.constant 1 : i32
      %16 = vector.broadcast %c1_i32_6 : i32 to vector<8x384xi32>
      %17 = arith.cmpi slt, %15, %16 : vector<8x384xi32>
      %cst = arith.constant 0.000000e+00 : f32
      %18 = vector.broadcast %cst : f32 to vector<8x384xf32>
      %19 = arith.select %17, %11, %18 : vector<8x384xi1>, vector<8x384xf32>
      %c0_7 = arith.constant 0 : index
      %c0_8 = arith.constant 0 : index
      %c0_9 = arith.constant 0 : index
      %20 = vector.load %arg3[%c0_7, %c0_8, %c0_9] : memref<1x8x384xf32, #tpu.memory_space<vmem>>, vector<1x8x384xf32>
      %21 = vector.shape_cast %20 : vector<1x8x384xf32> to vector<8x384xf32>
      %22 = vector.shape_cast %19 : vector<8x384xf32> to vector<1x8x384xf32>
      %cst_10 = arith.constant dense<0.000000e+00> : vector<8x384xf32>
      %23 = vector.multi_reduction <add>, %22, %cst_10 [0] : vector<1x8x384xf32> to vector<8x384xf32>
      %24 = arith.addf %21, %23 : vector<8x384xf32>
      %c0_11 = arith.constant 0 : index
      %c0_12 = arith.constant 0 : index
      %c0_13 = arith.constant 0 : index
      %25 = vector.load %arg3[%c0_11, %c0_12, %c0_13] : memref<1x8x384xf32, #tpu.memory_space<vmem>>, vector<1x8x384xf32>
      %26 = vector.shape_cast %25 : vector<1x8x384xf32> to vector<8x384xf32>
      %27 = vector.shape_cast %24 : vector<8x384xf32> to vector<1x8x384xf32>
      tpu.vector_store %arg3[%c0_11, %c0_12, %c0_13], %27 {strides = array<i32>} : memref<1x8x384xf32, #tpu.memory_space<vmem>>, vector<1x8x384xf32>,
    } else {
    }
    return
  }
  func.func @transform_0(%arg0: i32, %arg1: i32) -> (i32, i32) {
    %c1_i32 = arith.constant 1 : i32
    %0 = arith.muli %arg0, %c1_i32 : i32
    %1 = arith.addi %0, %arg1 : i32
    %c0_i32 = arith.constant 0 : i32
    %2 = arith.minsi %1, %c0_i32 : i32
    %c0_i32_0 = arith.constant 0 : i32
    %c0_i32_1 = arith.constant 0 : i32
    return %2, %c0_i32_0 : i32, i32
  }
  func.func @transform_1(%arg0: i32, %arg1: i32) -> (i32, i32, i32) {
    %c0_i32 = arith.constant 0 : i32
    %c0_i32_0 = arith.constant 0 : i32
    %c0_i32_1 = arith.constant 0 : i32
    return %arg0, %c0_i32, %c0_i32_0 : i32, i32, i32
  }
}

</mosaic_0001>

<bundles_post_ra>
// kernel: tpu_custom_call.1
= control target key start
LH: loop header
LB: loop body
LE: loop exit
PB: predicated region body
PF: predicated region fallthrough
CT: control target
= control target key end

     0   :  { %6 = vsyncpa [#allocation3], 0  ;;  %s356_s0 = inlined_call_operand.hbm [shape: f32[1,384], index: 0, kind: input, shape index: {}]   ;;  %s357_s1 = inlined_call_operand.hbm [shape: f32[1,8,384], index: 1, kind: output, shape index: {}]  }
   0x1   :  { %7 = vsyncpa [#allocation4], 0 }
   0x2   :  { %19 = vsyncadd [#allocation3], 336  ;;  %s335_s6 = smov [#allocation2]  }
   0x3   :  { %s25_s7 = sshll.u32 %s335_s6, 4  ;;  %s26_s7 = int_to_ptr.vmem [resolvable:$true] %s25_s7 }
   0x4   :  { %s299_s8 = scalar_lea.vmem %s26_s7, 48  ;;  %s303_s9 = scalar_lea.vmem %s26_s7, 384 }
   0x5   :  { %p300_p0 = scmp.ne.s32.totalorder %s26_s7, %s299_s8  ;;  %p304_p1 = scmp.lt.s32.totalorder %s26_s7, %s26_s7 }
   0x6   :  { %p305_p2 = scmp.lt.s32.totalorder %s303_s9, %s299_s8 }
   0x8   :  { %p306_p3 = por %p305_p2, %p304_p1 }
   0xa   :  { %p307_p4 = pnand %p306_p3, %p300_p0 }
   0xc   :  { %310 = shalt.err (!%p307_p4)
}
   0xd   :  { %s336_s10 = smov 48   ;;  %s337_s11 = smov 3  }
   0xe   :  { %31 = dma.hbm_to_vmem [thread:$0]  %s356_s0, 48, %s26_s7, [#allocation3], %s336_s10, %s336_s10, %s337_s11  }
   0xf   :  { %331 = dma.done.wait [#allocation3], 384  }
  0x10   :  { %332 = vsyncadd [#allocation3], 4294966912  ;;  %v169_v0 = vlaneseq  ;;  %v338_v1 = vmov 1966171168   ;;  %v161_v6 = vld [vmem:[#allocation2] sm:$0x7] }
  0x11   :  { %v188_v2 = vunpack.c.l.s4 %v338_v1  ;;  %v162_v7 = vld [vmem:[#allocation2 + $0x3] sm:$0x7]  ;;  %v163_v8 = vld [vmem:[#allocation2 + $0x6] sm:$0x7]  ;;  %v164_v9 = vld [vmem:[#allocation2 + $0x9] sm:$0x7] }
  0x12   :  { %v170_v3 = vshrl.u32 %v169_v0, 7  ;;  %v165_v10 = vld [vmem:[#allocation2 + $0xc] sm:$0x7]  ;;  %v166_v11 = vld [vmem:[#allocation2 + $0xf] sm:$0x7]  ;;  %v183_v12 = vcombine.low %v161_v6, %v162_v7  ;;  %v184_v15 = vcombine.low %v163_v8, %v164_v9  ;;  %s339_s0 = smov [#allocation5]  }
  0x13   :  { %v189_v4 = vunpack.c.0.s8 %v188_v2  ;;  %v167_v13 = vld [vmem:[#allocation2 + $0x12] sm:$0x7]  ;;  %v168_v14 = vld [vmem:[#allocation2 + $0x15] sm:$0x7]  ;;  %v185_v16 = vcombine.low %v165_v10, %v166_v11  ;;  %s274_s14 = sshll.u32 %s339_s0, 4  ;;  %s275_s14 = int_to_ptr.vmem [resolvable:$true] %s274_s14 }
  0x14   :  { %v186_v17 = vcombine.low %v167_v13, %v168_v14  ;;  %vm174_vm0 = vcmp.lt.s32.totalorder %v170_v3, 1  ;;  %s311_s15 = scalar_lea.vmem %s275_s14, 384  ;;  %p316_p6 = scmp.lt.s32.totalorder %s275_s14, %s275_s14 }
  0x15   :  { %v192_v5 = vsub.s32 %v189_v4, %v170_v3  ;;  %p312_p5 = scmp.ne.s32.totalorder %s275_s14, %s311_s15  ;;  %p317_p7 = scmp.lt.s32.totalorder %s311_s15, %s311_s15 }
  0x17   :  { %v193_v18 = vrot.slane %v183_v12, %v192_v5  ;;  %v200_v19 = vrot.slane %v184_v15, %v192_v5  ;;  %v207_v20 = vrot.slane %v185_v16, %v192_v5  ;;  %v214_v21 = vrot.slane %v186_v17, %v192_v5  ;;  %p318_p8 = por %p317_p7, %p316_p6 }
  0x19   :  { %v215_v22 = vcombine.low %v193_v18, %v200_v19  ;;  %v216_v23 = vcombine.high %v193_v18, %v200_v19  ;;  %v217_v24 = vcombine.low %v207_v20, %v214_v21  ;;  %v218_v25 = vcombine.high %v207_v20, %v214_v21  ;;  %p319_p9 = pnand %p318_p8, %p312_p5 }
  0x1b   :  { %v225_v26 = vrot.slane %v215_v22, %v192_v5  ;;  %v232_v27 = vrot.slane %v216_v23, %v192_v5  ;;  %v239_v28 = vrot.slane %v217_v24, %v192_v5  ;;  %v246_v29 = vrot.slane %v218_v25, %v192_v5 }
  0x1d   :  { %v247_v30 = vcombine.low %v225_v26, %v239_v28  ;;  %v249_v31 = vcombine.low %v232_v27, %v246_v29  ;;  %v248_v32 = vcombine.high %v225_v26, %v239_v28 }
  0x1f   :  { %v253_v33 = vsel %vm174_vm0, %v247_v30, 0.0  ;;  %v254_v34 = vsel %vm174_vm0, %v249_v31, 0.0  ;;  %v255_v35 = vsel %vm174_vm0, %v248_v32, 0.0 }
  0x20   :  { %265 = vst [vmem:[#allocation5] sm:$0xff] %v253_v33  ;;  %266 = vst [vmem:[#allocation5 + $0x8] sm:$0xff] %v254_v34 }
  0x21   :  { %267 = vst [vmem:[#allocation5 + $0x10] sm:$0xff] %v255_v35 }
  0x22   :  { %322 = shalt.err (!%p319_p9)
}
  0x23   :  { %277 = dma.vmem_to_hbm [thread:$0]  %s275_s14, 384, %s357_s1, [#allocation4]  }
  0x24   :  { %333 = dma.done.wait [#allocation4], 384  }
  0x25   :  { %334 = vsyncadd [#allocation4], 4294966912 }
  0x26   :  { %281 = vsyncpa [#allocation3], 1 }
  0x27   :  { %282 = vsyncpa [#allocation4], 1 }

</bundles_post_ra>
